<compile_context>
chip_gen: v6e
topology: v6e:2x2x1
jax: 0.10.0
libtpu: 0.0.40
codegen_flags: <defaults>
</compile_context>

<pallas_src>
import jax
import jax.numpy as jnp
from jax.experimental import pallas as pl
from jax.experimental.pallas import tpu as pltpu

_LANES = 128       # lane width: last dim of the 2-D slab
_MIN_STEPS = 4     # >=4 pipeline steps once the tensor is >= ~1 MiB
_SMALL_BYTES = 1 << 20  # below this, a single full-array block is fine

# Generation-gated (max_block_bytes, vmem_limit_bytes) — resolved lazily.
_TILING_CACHE = None


def _tiling():
    """Pick the per-step block size (bytes) and scoped-VMEM limit per chip."""
    global _TILING_CACHE
    if _TILING_CACHE is None:
        kind = ""
        try:
            kind = jax.devices()[0].device_kind.lower()
        except Exception:
            pass
        if "v7" in kind or "7x" in kind:
            # 8 MiB blocks: in+out double-buffered = 32 MiB > 32 MiB scoped
            # default, so raise the limit explicitly (64 MiB physical VMEM).
            _TILING_CACHE = (8 << 20, 40 << 20)
        elif "v6" in kind:
            # 4 MiB blocks: 16 MiB total, inside the 32 MiB scoped default.
            _TILING_CACHE = (4 << 20, None)
        else:
            # v5e (16 MiB scoped default) and anything unknown: 2 MiB blocks.
            _TILING_CACHE = (2 << 20, None)
    return _TILING_CACHE


def _hard_sigmoid_kernel(x_ref, o_ref):
    x = x_ref[...]
    # one mul + one add + clip (VALU max/min): minimal VALU pressure,
    # memory-bound regardless.
    out = jnp.clip(x * (1.0 / 6.0) + 0.5, 0.0, 1.0)
    o_ref[...] = out.astype(o_ref.dtype)


def _hard_sigmoid_jnp(x):
    """Plain-jnp path for tiny arrays / the <128-element ragged tail."""
    return jnp.clip(x * (1.0 / 6.0) + 0.5, 0.0, 1.0).astype(x.dtype)


def _run_pallas(x2d):
    """x2d: (rows, 128) lane-dense slab."""
    rows = x2d.shape[0]
    dtype = x2d.dtype
    itemsize = jnp.dtype(dtype).itemsize
    nbytes = rows * _LANES * itemsize

    max_block_bytes, vmem_limit = _tiling()
    # Max rows per block for this dtype, multiple of 128 rows (keeps the
    # sublane dim aligned for every dtype: f32/bf16/int8).
    max_block_rows = max(128, (max_block_bytes // (_LANES * itemsize)) // 128 * 128)

    if nbytes <= _SMALL_BYTES or rows <= 128:
        # Small tensor: single full-array block (always a legal block shape);
        # pipelining would only add per-step overhead here.
        block_rows = rows
    else:
        # >= _MIN_STEPS steps so DMA/compute overlap and (on v7x) both
        # TensorCores get work; round the block to a multiple of 128 rows.
        target = pl.cdiv(rows, _MIN_STEPS)
        target = pl.cdiv(target, 128) * 128
        block_rows = min(max_block_rows, max(512, target))
    grid = pl.cdiv(rows, block_rows)

    n = rows * _LANES
    cost = pl.CostEstimate(
        flops=4 * n,              # mul + add + max + min per element
        transcendentals=0,
        bytes_accessed=2 * n * itemsize)

    cp_kwargs = dict(dimension_semantics=("parallel",))
    if vmem_limit is not None:
        cp_kwargs["vmem_limit_bytes"] = vmem_limit

    return pl.pallas_call(
        _hard_sigmoid_kernel,
        out_shape=jax.ShapeDtypeStruct((rows, _LANES), dtype),
        grid=(grid,),
        in_specs=[pl.BlockSpec((block_rows, _LANES), lambda i: (i, 0))],
        out_specs=pl.BlockSpec((block_rows, _LANES), lambda i: (i, 0)),
        compiler_params=pltpu.CompilerParams(**cp_kwargs),
        cost_estimate=cost,
        # In-place elementwise: reuse the input HBM buffer for the output.
        # (Under jit, donate x at the call site to avoid a defensive copy.)
        input_output_aliases={0: 0},
    )(x2d)


def hard_sigmoid_count(x: jax.Array) -> jax.Array:
    """Elementwise hard-sigmoid forward. Any shape/float dtype; hot path is Pallas."""
    orig_shape = x.shape
    n = x.size
    if n == 0:
        return x
    flat = x.reshape(-1)

    aligned = (n // _LANES) * _LANES
    if aligned == 0:
        # Fewer than 128 elements: not worth a kernel launch.
        return _hard_sigmoid_jnp(flat).reshape(orig_shape)

    if aligned == n:
        # Fast path: numel is a multiple of 128 — no pad, no slice, no concat.
        out = _run_pallas(flat.reshape(-1, _LANES))
        return out.reshape(orig_shape)

    # Ragged path: Pallas on the 128-aligned prefix, jnp on the (<128) tail.
    head = _run_pallas(flat[:aligned].reshape(-1, _LANES)).reshape(-1)
    tail = _hard_sigmoid_jnp(flat[aligned:])
    return jnp.concatenate([head, tail]).reshape(orig_shape)


def hard_sigmoid_ref(x: jax.Array) -> jax.Array:
    """Pure-JAX reference, matching the PyTorch forward exactly."""
    mid = x / 6.0 + 0.5
    out = jnp.where(x <= -3.0, jnp.zeros_like(x), mid)
    out = jnp.where(x >= 3.0, jnp.ones_like(x), out)
    return out.astype(x.dtype)


def _check(x):
    out = jax.block_until_ready(hard_sigmoid_count(x))
    ref = hard_sigmoid_ref(x)
    assert out.shape == x.shape and out.dtype == x.dtype
    # dtype-aware tolerance (x*(1/6)+0.5 vs x/6+0.5 differ by <= 1 ulp).
    atol = 2e-2 if x.dtype in (jnp.bfloat16, jnp.float16) else 1e-6
    assert jnp.allclose(out.astype(jnp.float32), ref.astype(jnp.float32),
                        atol=atol), "mismatch vs reference"


if __name__ == "__main__":
    key = jax.random.PRNGKey(0)

    # Primary NCHW input like the PyTorch module would typically see.
    x = jax.random.normal(key, (2, 4, 16, 16), dtype=jnp.float32) * 4.0
    # Exercise exact boundary values (<= / >= branches).
    x = x.at[0, 0, 0, 0].set(-3.0).at[0, 0, 0, 1].set(3.0)
    _check(x)

    k1, k2, k3 = jax.random.split(key, 3)

    # Ragged path: numel not a multiple of 128 (aligned prefix + jnp tail).
    x_odd = jax.random.normal(k1, (1, 3, 33, 37), dtype=jnp.float32) * 4.0
    _check(x_odd)

    # Multi-block path: >= 1 MiB so the grid has >= 4 pipelined steps.
    x_big = jax.random.normal(k2, (8, 8, 96, 96), dtype=jnp.float32) * 4.0
    _check(x_big)

    # bf16 I/O (the byte-reducing lever when the surrounding model allows it).
    x_bf16 = (jax.random.normal(k3, (2, 4, 16, 16), dtype=jnp.float32) * 4.0
              ).astype(jnp.bfloat16)
    _check(x_bf16)

    # Tiny (<128 elements) pure-jnp fallback.
    x_tiny = jax.random.normal(key, (5, 7), dtype=jnp.float32) * 4.0
    _check(x_tiny)

    # TODO(synk): backward-pass counters (TOTAL_RELU_CALL / ZERO_RELU_CALL) and
    # `tol` only affect gradients, which are out of scope for this forward kernel.
    print("KERNEL_OK")
</pallas_src>

<mosaic_0001>
module attributes {stable_mosaic.version = 11 : i64} {
  func.func @_hard_sigmoid_kernel(%arg0: i32, %arg1: memref<16x128xf32, #tpu.memory_space<vmem>>, %arg2: memref<16x128xf32, #tpu.memory_space<vmem>>) attributes {dimension_semantics = [#tpu.dimension_semantics<parallel>], iteration_bounds = array<i64: 1>, scalar_prefetch = 0 : i64, scratch_operands = 0 : i64, tpu.core_type = #tpu.core_type<tc>, window_params = [{transform_indices = @transform_0, window_bounds = array<i64: 16, 128>}, {transform_indices = @transform_1, window_bounds = array<i64: 16, 128>}]} {
    %c0 = arith.constant 0 : index
    %c0_0 = arith.constant 0 : index
    %0 = vector.load %arg1[%c0, %c0_0] : memref<16x128xf32, #tpu.memory_space<vmem>>, vector<16x128xf32>
    %cst = arith.constant 0.166666672 : f32
    %1 = vector.broadcast %cst : f32 to vector<16x128xf32>
    %2 = arith.mulf %0, %1 : vector<16x128xf32>
    %cst_1 = arith.constant 5.000000e-01 : f32
    %3 = vector.broadcast %cst_1 : f32 to vector<16x128xf32>
    %4 = arith.addf %2, %3 : vector<16x128xf32>
    %cst_2 = arith.constant 0.000000e+00 : f32
    %cst_3 = arith.constant 1.000000e+00 : f32
    %5 = vector.broadcast %cst_2 : f32 to vector<16x128xf32>
    %6 = arith.maximumf %5, %4 : vector<16x128xf32>
    %7 = vector.broadcast %cst_3 : f32 to vector<16x128xf32>
    %8 = arith.minimumf %7, %6 : vector<16x128xf32>
    %c0_4 = arith.constant 0 : index
    %c0_5 = arith.constant 0 : index
    %9 = vector.load %arg2[%c0_4, %c0_5] : memref<16x128xf32, #tpu.memory_space<vmem>>, vector<16x128xf32>
    tpu.vector_store %arg2[%c0_4, %c0_5], %8 {strides = array<i32>} : memref<16x128xf32, #tpu.memory_space<vmem>>, vector<16x128xf32>,
    return
  }
  func.func @transform_0(%arg0: i32) -> (i32, i32) {
    %c0_i32 = arith.constant 0 : i32
    %c0_i32_0 = arith.constant 0 : i32
    return %arg0, %c0_i32 : i32, i32
  }
  func.func @transform_1(%arg0: i32) -> (i32, i32) {
    %c0_i32 = arith.constant 0 : i32
    %c0_i32_0 = arith.constant 0 : i32
    return %arg0, %c0_i32 : i32, i32
  }
}

</mosaic_0001>

<bundles_post_ra>
// kernel: tpu_custom_call.1
= control target key start
LH: loop header
LB: loop body
LE: loop exit
PB: predicated region body
PF: predicated region fallthrough
CT: control target
= control target key end

     0   :  { %6 = vsyncpa [#allocation3], 0  ;;  %s126_s0 = inlined_call_operand.hbm [shape: f32[16,128], index: 0, kind: input, shape index: {}, may-alias: {0,1}]   ;;  %s127_s1 = inlined_call_operand.hbm [shape: f32[16,128], index: 1, kind: output, shape index: {}, may-alias: {0,1}]  }
   0x1   :  { %7 = vsyncpa [#allocation4], 0  ;;  %s100_s6 = smov [#allocation2]  }
   0x2   :  { %s13_s7 = sshll.u32 %s100_s6, 4  ;;  %s14_s7 = int_to_ptr.vmem [resolvable:$true] %s13_s7 }
   0x3   :  { %s64_s8 = scalar_lea.vmem %s14_s7, 256  ;;  %p69_p1 = scmp.lt.s32.totalorder %s14_s7, %s14_s7 }
   0x4   :  { %p65_p0 = scmp.ne.s32.totalorder %s14_s7, %s64_s8  ;;  %p70_p2 = scmp.lt.s32.totalorder %s64_s8, %s64_s8 }
   0x6   :  { %p71_p3 = por %p70_p2, %p69_p1 }
   0x8   :  { %p72_p4 = pnand %p71_p3, %p65_p0 }
   0xa   :  { %75 = shalt.err (!%p72_p4)
}
   0xb   :  { %s101_s9 = smov 128   ;;  %s102_s10 = smov 8  }
   0xc   :  { %19 = dma.hbm_to_vmem [thread:$0]  %s126_s0, 256, %s14_s7, [#allocation3], %s101_s9, %s101_s9, %s102_s10  }
   0xd   :  { %96 = dma.done.wait [#allocation3], 256  }
   0xe   :  { %97 = vsyncadd [#allocation3], 4294967040  ;;  %v23_v0 = vld [vmem:[#allocation2] sm:$0xff]  ;;  %v24_v1 = vld [vmem:[#allocation2 + $0x8] sm:$0xff]  ;;  %s103_s13 = smov [#allocation5]  }
   0xf   :  { %v25_v2 = vmul.f32 0.16666667, %v23_v0  ;;  %v26_v3 = vmul.f32 0.16666667, %v24_v1  ;;  %s40_s14 = sshll.u32 %s103_s13, 4  ;;  %s41_s14 = int_to_ptr.vmem [resolvable:$true] %s40_s14 }
  0x10   :  { %s76_s15 = scalar_lea.vmem %s41_s14, 256  ;;  %p81_p6 = scmp.lt.s32.totalorder %s41_s14, %s41_s14 }
  0x11   :  { %v27_v4 = vadd.f32 0.5, %v25_v2  ;;  %v28_v5 = vadd.f32 0.5, %v26_v3  ;;  %p77_p5 = scmp.ne.s32.totalorder %s41_s14, %s76_s15  ;;  %p82_p7 = scmp.lt.s32.totalorder %s76_s15, %s76_s15 }
  0x13   :  { %v29_v6 = vmax.f32 %v27_v4, 0.0  ;;  %v30_v7 = vmax.f32 %v28_v5, 0.0  ;;  %p83_p8 = por %p82_p7, %p81_p6 }
  0x15   :  { %v31_v8 = vmin.f32 %v29_v6, 1.0  ;;  %v32_v9 = vmin.f32 %v30_v7, 1.0  ;;  %p84_p9 = pnand %p83_p8, %p77_p5 }
  0x17   :  { %33 = vst [vmem:[#allocation5] sm:$0xff] %v31_v8  ;;  %34 = vst [vmem:[#allocation5 + $0x8] sm:$0xff] %v32_v9 }
  0x18   :  { %87 = shalt.err (!%p84_p9)
}
  0x19   :  { %46 = dma.vmem_to_hbm [thread:$0]  %s41_s14, 256, %s127_s1, [#allocation4], %s101_s9, %s101_s9, %s102_s10  }
  0x1a   :  { %98 = dma.done.wait [#allocation4], 256  }
  0x1b   :  { %99 = vsyncadd [#allocation4], 4294967040 }
  0x1c   :  { %50 = vsyncpa [#allocation3], 1 }
  0x1d   :  { %51 = vsyncpa [#allocation4], 1 }

</bundles_post_ra>
